<compile_context>
chip_gen: v7x
topology: tpu7x:2x2x1
jax: 0.10.0
libtpu: 0.0.40
codegen_flags: <defaults>
</compile_context>

<pallas_src>
import jax
import jax.numpy as jnp
import numpy as np
from jax.experimental import pallas as pl
from jax.experimental.pallas import tpu as pltpu

LANE = 128
VMEM_LIMIT = 32 * 1024 * 1024  # explicit scoped-VMEM budget (safe on v5e/v6e/v7x)


# ------------------------------ small helpers --------------------------------

def _round_up(x, m):
    return (x + m - 1) // m * m


def _pad2(a, rows, cols):
    return jnp.pad(a, ((0, rows - a.shape[0]), (0, cols - a.shape[1])))


def _pick_tile(n, candidates):
    for c in candidates:
        if n % c == 0:
            return c
    return LANE


# ----------------------------- Pallas kernels -------------------------------

def sage_kernel(a_ref, xk_ref, xr_ref, wl_ref, wr_ref, shift_ref, o_ref, acc_ref):
    """One (row-tile, K-tile) step of  relu((A @ x) @ W_l' + x @ W_r' + shift').

    a_ref:     [tm, tk]  bf16 adjacency tile           (A[dst, src])
    xk_ref:    [tk, D]   bf16 neighbour features (K slab of x)
    xr_ref:    [tm, D]   bf16 root features (row slab of x)
    wl_ref:    [D, H]    bf16 BN-folded lin_l weight
    wr_ref:    [D, H]    bf16 BN-folded lin_r weight
    shift_ref: [1, H]    f32  BN-folded shift (includes lin_l bias)
    o_ref:     [tm, H]   bf16 layer output row tile
    acc_ref:   [tm, D]   f32  aggregation accumulator (persists across K tiles)
    """
    k = pl.program_id(1)

    @pl.when(k == 0)
    def _init():
        acc_ref[...] = jnp.zeros_like(acc_ref)

    # Dominant matmul on the MXU: bf16 operands, f32 accumulation.
    acc_ref[...] += jnp.dot(a_ref[...], xk_ref[...],
                            preferred_element_type=jnp.float32)

    @pl.when(k == pl.num_programs(1) - 1)
    def _finalize():
        agg = acc_ref[...].astype(jnp.bfloat16)
        h = (jnp.dot(agg, wl_ref[...], preferred_element_type=jnp.float32)
             + jnp.dot(xr_ref[...], wr_ref[...], preferred_element_type=jnp.float32)
             + shift_ref[...])
        # BN already folded into the weights; dropout is identity in eval mode.
        o_ref[...] = jnp.maximum(h, 0.0).astype(o_ref.dtype)


def pool_mlp_kernel(p_ref, h_ref, w1_ref, b1_ref, w2_ref, b2_ref, w3_ref, b3_ref,
                    o_ref, g_ref):
    """global_add_pool (K-tiled P @ h) + 3-layer MLP head at the last K tile.

    p_ref:  [Bp, tk]  bf16 pooling matrix slab
    h_ref:  [tk, H]   bf16 node features slab
    w1_ref: [H, M]    bf16 first Linear (graph-embedding slice of W1)
    b1_ref: [Bp, M]   f32  per-graph bias = extras @ W1e + b1 (host-folded)
    w2_ref: [M, M2] bf16, b2_ref: [1, M2] f32
    w3_ref: [M2, T] bf16, b3_ref: [1, T]  f32
    o_ref:  [Bp, T]   f32
    g_ref:  [Bp, H]   f32  pooled-embedding accumulator
    """
    k = pl.program_id(0)

    @pl.when(k == 0)
    def _init():
        g_ref[...] = jnp.zeros_like(g_ref)

    g_ref[...] += jnp.dot(p_ref[...], h_ref[...],
                          preferred_element_type=jnp.float32)

    @pl.when(k == pl.num_programs(0) - 1)
    def _finalize():
        g = g_ref[...].astype(jnp.bfloat16)
        h1 = jnp.maximum(
            jnp.dot(g, w1_ref[...], preferred_element_type=jnp.float32)
            + b1_ref[...], 0.0)
        h2 = jnp.maximum(
            jnp.dot(h1.astype(jnp.bfloat16), w2_ref[...],
                    preferred_element_type=jnp.float32) + b2_ref[...], 0.0)
        o_ref[...] = (jnp.dot(h2.astype(jnp.bfloat16), w3_ref[...],
                              preferred_element_type=jnp.float32) + b3_ref[...])


# ----------------------------- Python wrappers -------------------------------

def sage_layer(x, A, W_l, W_r, shift, *, tm, tk):
    """x: [Np, D] bf16, A: [Np, Np] bf16, W_*: [D, H] bf16, shift: [1, H] f32."""
    n_pad, d = x.shape
    h_pad = W_l.shape[1]
    grid = (n_pad // tm, n_pad // tk)
    flops = 2 * n_pad * n_pad * d + 4 * n_pad * d * h_pad
    bytes_accessed = (2 * (A.size + 2 * x.size + W_l.size + W_r.size
                           + n_pad * h_pad) + 4 * shift.size)
    return pl.pallas_call(
        sage_kernel,
        out_shape=jax.ShapeDtypeStruct((n_pad, h_pad), jnp.bfloat16),
        grid_spec=pltpu.PrefetchScalarGridSpec(
            num_scalar_prefetch=0,
            grid=grid,
            in_specs=[
                pl.BlockSpec((tm, tk), lambda r, k: (r, k)),     # A tile
                pl.BlockSpec((tk, d), lambda r, k: (k, 0)),      # x (neighbour slab)
                pl.BlockSpec((tm, d), lambda r, k: (r, 0)),      # x (root row slab)
                pl.BlockSpec((d, h_pad), lambda r, k: (0, 0)),   # W_l' (resident)
                pl.BlockSpec((d, h_pad), lambda r, k: (0, 0)),   # W_r' (resident)
                pl.BlockSpec((1, h_pad), lambda r, k: (0, 0)),   # shift' (resident)
            ],
            out_specs=pl.BlockSpec((tm, h_pad), lambda r, k: (r, 0)),
            scratch_shapes=[pltpu.VMEM((tm, d), jnp.float32)],
        ),
        compiler_params=pltpu.CompilerParams(
            dimension_semantics=("parallel", "arbitrary"),
            vmem_limit_bytes=VMEM_LIMIT),
        cost_estimate=pl.CostEstimate(flops=int(flops), transcendentals=0,
                                      bytes_accessed=int(bytes_accessed)),
    )(A, x, x, W_l, W_r, shift)


def pool_and_mlp(P, h, W1g, bias1, W2, b2, W3, b3, *, tk):
    b_pad, n_pad = P.shape
    h_pad = h.shape[1]
    m_pad = W1g.shape[1]
    m2_pad = W2.shape[1]
    t_pad = W3.shape[1]
    flops = (2 * b_pad * n_pad * h_pad
             + 2 * b_pad * (h_pad * m_pad + m_pad * m2_pad + m2_pad * t_pad))
    bytes_accessed = (2 * (P.size + h.size + W1g.size + W2.size + W3.size)
                      + 4 * (bias1.size + b2.size + b3.size + b_pad * t_pad))
    return pl.pallas_call(
        pool_mlp_kernel,
        out_shape=jax.ShapeDtypeStruct((b_pad, t_pad), jnp.float32),
        grid_spec=pltpu.PrefetchScalarGridSpec(
            num_scalar_prefetch=0,
            grid=(n_pad // tk,),
            in_specs=[
                pl.BlockSpec((b_pad, tk), lambda k: (0, k)),       # P slab
                pl.BlockSpec((tk, h_pad), lambda k: (k, 0)),       # h slab
                pl.BlockSpec((h_pad, m_pad), lambda k: (0, 0)),    # W1 (graph part)
                pl.BlockSpec((b_pad, m_pad), lambda k: (0, 0)),    # per-graph bias
                pl.BlockSpec((m_pad, m2_pad), lambda k: (0, 0)),   # W2
                pl.BlockSpec((1, m2_pad), lambda k: (0, 0)),       # b2
                pl.BlockSpec((m2_pad, t_pad), lambda k: (0, 0)),   # W3
                pl.BlockSpec((1, t_pad), lambda k: (0, 0)),        # b3
            ],
            out_specs=pl.BlockSpec((b_pad, t_pad), lambda k: (0, 0)),
            scratch_shapes=[pltpu.VMEM((b_pad, h_pad), jnp.float32)],
        ),
        compiler_params=pltpu.CompilerParams(
            dimension_semantics=("arbitrary",),
            vmem_limit_bytes=VMEM_LIMIT),
        cost_estimate=pl.CostEstimate(flops=int(flops), transcendentals=0,
                                      bytes_accessed=int(bytes_accessed)),
    )(P, h, W1g, bias1, W2, b2, W3, b3)


# ----------------------------- Model definition ------------------------------

def init_params(key, node_feature_dim, num_targets, hidden_dim, num_gnn_layers,
                mlp_hidden_dim):
    """Deterministic synthetic parameters (shapes mirror the PyTorch module;
    weights stored transposed so x @ W works directly)."""
    params = {"convs": [], "bns": []}
    dims = [node_feature_dim] + [hidden_dim] * num_gnn_layers
    for i in range(num_gnn_layers):
        fin, fout = dims[i], dims[i + 1]
        key, k1, k2, k3 = jax.random.split(key, 4)
        params["convs"].append({
            "W_l": jax.random.normal(k1, (fin, fout), jnp.float32) * 0.1,
            "b_l": jax.random.normal(k2, (1, fout), jnp.float32) * 0.05,
            "W_r": jax.random.normal(k3, (fin, fout), jnp.float32) * 0.1,  # no bias (PyG)
        })
        key, k1, k2, k3, k4 = jax.random.split(key, 5)
        params["bns"].append({
            "gamma": 1.0 + 0.1 * jax.random.normal(k1, (1, fout), jnp.float32),
            "beta": 0.05 * jax.random.normal(k2, (1, fout), jnp.float32),
            "mean": 0.05 * jax.random.normal(k3, (1, fout), jnp.float32),
            "var": 1.0 + 0.1 * jax.random.uniform(k4, (1, fout), jnp.float32),
        })

    m, m2 = mlp_hidden_dim, mlp_hidden_dim // 2
    key, k1, k2, k3, k4, k5, k6 = jax.random.split(key, 7)
    params["mlp"] = {
        "W1": jax.random.normal(k1, (hidden_dim + 4, m), jnp.float32) * 0.1,
        "b1": jax.random.normal(k2, (1, m), jnp.float32) * 0.05,
        "W2": jax.random.normal(k3, (m, m2), jnp.float32) * 0.1,
        "b2": jax.random.normal(k4, (1, m2), jnp.float32) * 0.05,
        "W3": jax.random.normal(k5, (m2, num_targets), jnp.float32) * 0.1,
        "b3": jax.random.normal(k6, (1, num_targets), jnp.float32) * 0.05,
    }
    return params


def prepare_params(params, eps=1e-5):
    """One-time host-side prep: fold BN (inference) + lin_l bias into the SAGE
    weights, pad every feature dim to the 128-lane width, cast matmul operands
    to bf16 (accumulation stays f32 inside the kernels)."""
    F = params["convs"][0]["W_l"].shape[0]
    H = params["convs"][0]["W_l"].shape[1]
    F_pad = _round_up(F, LANE)
    H_pad = _round_up(H, LANE)

    layers = []
    in_pads = [F_pad] + [H_pad] * (len(params["convs"]) - 1)
    for conv, bn, in_pad in zip(params["convs"], params["bns"], in_pads):
        scale = bn["gamma"] / jnp.sqrt(bn["var"] + eps)              # [1, H]
        shift = bn["beta"] - bn["mean"] * scale + conv["b_l"] * scale
        layers.append({
            "W_l": _pad2(conv["W_l"] * scale, in_pad, H_pad).astype(jnp.bfloat16),
            "W_r": _pad2(conv["W_r"] * scale, in_pad, H_pad).astype(jnp.bfloat16),
            "shift": _pad2(shift, 1, H_pad),                          # f32
        })

    mlp = params["mlp"]
    M, M2 = mlp["W2"].shape
    T = mlp["W3"].shape[1]
    M_pad, M2_pad, T_pad = (_round_up(v, LANE) for v in (M, M2, T))
    return {
        "layers": layers,
        "F": F, "F_pad": F_pad, "H": H, "H_pad": H_pad,
        "M_pad": M_pad, "M2_pad": M2_pad, "T": T, "T_pad": T_pad,
        "W1g": _pad2(mlp["W1"][:H, :], H_pad, M_pad).astype(jnp.bfloat16),
        "W1e": mlp["W1"][H:, :],   # [4, M] — folded with extras on the host
        "b1": mlp["b1"],           # [1, M]
        "W2": _pad2(mlp["W2"], M_pad, M2_pad).astype(jnp.bfloat16),
        "b2": _pad2(mlp["b2"], 1, M2_pad),
        "W3": _pad2(mlp["W3"], M2_pad, T_pad).astype(jnp.bfloat16),
        "b3": _pad2(mlp["b3"], 1, T_pad),
    }


def fpga_gnn_forward(prep, x, edge_index, batch, strategy, io_type, num_graphs):
    """Forward pass mirroring FPGA_GNN.forward (eval mode)."""
    N, F = x.shape
    N_pad = _round_up(max(N, LANE), LANE)
    tm = _pick_tile(N_pad, (512, 256, 128))       # row tile (generation-safe sizes)
    tk = _pick_tile(N_pad, (1024, 512, 256, 128))  # reduction tile
    B_pad = _round_up(max(num_graphs, 8), 8)

    # Dense adjacency A[dst, src] (glue: scatter build).  bf16 is exact for small
    # integer edge multiplicities.
    A = jnp.zeros((N_pad, N_pad), jnp.float32)
    A = A.at[edge_index[1], edge_index[0]].add(1.0).astype(jnp.bfloat16)

    h = _pad2(x.astype(jnp.float32), N_pad, prep["F_pad"]).astype(jnp.bfloat16)
    for layer in prep["layers"]:
        h = sage_layer(h, A, layer["W_l"], layer["W_r"], layer["shift"],
                       tm=tm, tk=tk)
        # F.dropout(training=False) -> identity

    # global_add_pool as P @ h (padded nodes map to no graph; padded graphs are inert).
    batch_pad = jnp.pad(batch, (0, N_pad - N), constant_values=-1)
    P = (batch_pad[None, :] == jnp.arange(B_pad)[:, None]).astype(jnp.bfloat16)

    # Squeeze possible trailing singleton dim (mirrors the PyTorch checks).
    if strategy.ndim == 3 and strategy.shape[2] == 1:
        strategy = strategy[..., 0]
    if io_type.ndim == 3 and io_type.shape[2] == 1:
        io_type = io_type[..., 0]
    extras = jnp.concatenate([strategy.astype(jnp.float32),
                              io_type.astype(jnp.float32)], axis=1)       # [B, 4]
    # Tiny 4-wide contraction folded on the host into a per-graph bias.
    bias1 = _pad2(extras @ prep["W1e"] + prep["b1"], B_pad, prep["M_pad"])

    out_pad = pool_and_mlp(P, h, prep["W1g"], bias1, prep["W2"], prep["b2"],
                           prep["W3"], prep["b3"], tk=tk)
    return out_pad[:num_graphs, :prep["T"]]


# --------------------------- pure-JAX reference -------------------------------

def reference_forward(params, x, edge_index, batch, strategy, io_type, num_graphs,
                      eps=1e-5):
    N = x.shape[0]
    A = jnp.zeros((N, N), jnp.float32).at[edge_index[1], edge_index[0]].add(1.0)
    h = x.astype(jnp.float32)
    for conv, bn in zip(params["convs"], params["bns"]):
        lin = (A @ h) @ conv["W_l"] + conv["b_l"] + h @ conv["W_r"]
        scale = bn["gamma"] / jnp.sqrt(bn["var"] + eps)
        h = jnp.maximum(lin * scale + (bn["beta"] - bn["mean"] * scale), 0.0)
    P = (batch[None, :] == jnp.arange(num_graphs)[:, None]).astype(jnp.float32)
    g = P @ h
    comb = jnp.concatenate([g, strategy.astype(jnp.float32),
                            io_type.astype(jnp.float32)], axis=1)
    mlp = params["mlp"]
    h1 = jnp.maximum(comb @ mlp["W1"] + mlp["b1"], 0.0)
    h2 = jnp.maximum(h1 @ mlp["W2"] + mlp["b2"], 0.0)
    return h2 @ mlp["W3"] + mlp["b3"]


# ----------------------------------- main ------------------------------------

if __name__ == "__main__":
    # Small deterministic problem sizes (exercise the padding paths too).
    node_feature_dim = 8
    num_targets = 6
    hidden_dim = 32
    num_gnn_layers = 2
    mlp_hidden_dim = 16
    num_nodes = 16
    num_graphs = 2
    nodes_per_graph = num_nodes // num_graphs

    key = jax.random.PRNGKey(0)
    key, kx, ks, ki, kp = jax.random.split(key, 5)

    x = jax.random.normal(kx, (num_nodes, node_feature_dim), jnp.float32)

    # Two ring graphs (both edge directions).
    src_list, dst_list = [], []
    for g in range(num_graphs):
        base = g * nodes_per_graph
        for n in range(nodes_per_graph):
            src_list += [base + n, base + (n + 1) % nodes_per_graph]
            dst_list += [base + (n + 1) % nodes_per_graph, base + n]
    edge_index = jnp.array([src_list, dst_list], dtype=jnp.int32)        # [2, E]

    batch = jnp.repeat(jnp.arange(num_graphs, dtype=jnp.int32), nodes_per_graph)
    strategy = jax.random.normal(ks, (num_graphs, 2), jnp.float32)       # [B, 2]
    io_type = jax.random.normal(ki, (num_graphs, 2), jnp.float32)        # [B, 2]

    params = init_params(kp, node_feature_dim, num_targets, hidden_dim,
                         num_gnn_layers, mlp_hidden_dim)
    prep = prepare_params(params)

    out = fpga_gnn_forward(prep, x, edge_index, batch, strategy, io_type, num_graphs)
    out = jax.block_until_ready(out)
    assert out.shape == (num_graphs, num_targets), out.shape

    # Correctness check vs. pure-JAX f32 reference (loose tolerance: bf16 operands).
    ref = reference_forward(params, x, edge_index, batch, strategy, io_type, num_graphs)
    np.testing.assert_allclose(np.asarray(out), np.asarray(ref), rtol=5e-2, atol=5e-2)

    print("KERNEL_OK")
</pallas_src>

<mosaic_0001>
module attributes {stable_mosaic.version = 11 : i64} {
  func.func @sage_kernel(%arg0: i32, %arg1: i32, %arg2: memref<128x128xbf16, #tpu.memory_space<vmem>>, %arg3: memref<128x128xbf16, #tpu.memory_space<vmem>>, %arg4: memref<128x128xbf16, #tpu.memory_space<vmem>>, %arg5: memref<128x128xbf16, #tpu.memory_space<vmem>>, %arg6: memref<128x128xbf16, #tpu.memory_space<vmem>>, %arg7: memref<1x128xf32, #tpu.memory_space<vmem>>, %arg8: memref<128x128xbf16, #tpu.memory_space<vmem>>, %arg9: memref<128x128xf32, #tpu.memory_space<vmem>>) attributes {dimension_semantics = [#tpu.dimension_semantics<parallel>, #tpu.dimension_semantics<arbitrary>], iteration_bounds = array<i64: 1, 1>, scalar_prefetch = 0 : i64, scratch_operands = 1 : i64, tpu.core_type = #tpu.core_type<tc>, window_params = [{transform_indices = @transform_0, window_bounds = array<i64: 128, 128>}, {transform_indices = @transform_1, window_bounds = array<i64: 128, 128>}, {transform_indices = @transform_2, window_bounds = array<i64: 128, 128>}, {pipeline_mode = #tpu.pipeline_mode<synchronous>, transform_indices = @transform_3, window_bounds = array<i64: 128, 128>}, {pipeline_mode = #tpu.pipeline_mode<synchronous>, transform_indices = @transform_4, window_bounds = array<i64: 128, 128>}, {pipeline_mode = #tpu.pipeline_mode<synchronous>, transform_indices = @transform_5, window_bounds = array<i64: 1, 128>}, {transform_indices = @transform_6, window_bounds = array<i64: 128, 128>}]} {
    %c0_i32 = arith.constant 0 : i32
    %0 = arith.cmpi eq, %arg1, %c0_i32 : i32
    %1 = arith.extui %0 : i1 to i32
    %c0_i32_0 = arith.constant 0 : i32
    %2 = arith.cmpi ne, %1, %c0_i32_0 : i32
    scf.if %2 {
      %cst_10 = arith.constant 0.000000e+00 : f32
      %12 = vector.broadcast %cst_10 : f32 to vector<128x128xf32>
      %c0_11 = arith.constant 0 : index
      %c0_12 = arith.constant 0 : index
      %13 = vector.load %arg9[%c0_11, %c0_12] : memref<128x128xf32, #tpu.memory_space<vmem>>, vector<128x128xf32>
      tpu.vector_store %arg9[%c0_11, %c0_12], %12 {strides = array<i32>} : memref<128x128xf32, #tpu.memory_space<vmem>>, vector<128x128xf32>,
    } else {
    }
    %c0 = arith.constant 0 : index
    %c0_1 = arith.constant 0 : index
    %3 = vector.load %arg9[%c0, %c0_1] : memref<128x128xf32, #tpu.memory_space<vmem>>, vector<128x128xf32>
    %c0_2 = arith.constant 0 : index
    %c0_3 = arith.constant 0 : index
    %4 = vector.load %arg2[%c0_2, %c0_3] : memref<128x128xbf16, #tpu.memory_space<vmem>>, vector<128x128xbf16>
    %c0_4 = arith.constant 0 : index
    %c0_5 = arith.constant 0 : index
    %5 = vector.load %arg3[%c0_4, %c0_5] : memref<128x128xbf16, #tpu.memory_space<vmem>>, vector<128x128xbf16>
    %cst = arith.constant dense<0.000000e+00> : vector<128x128xf32>
    %6 = tpu.matmul %4, %5, %cst {dimension_numbers = #tpu.dot_dimension_numbers<[1], [0], [0], [1], [0, 0, 1, 1], [], []>} : vector<128x128xbf16>, vector<128x128xbf16>, vector<128x128xf32> -> vector<128x128xf32>
    %7 = arith.addf %3, %6 : vector<128x128xf32>
    %c0_6 = arith.constant 0 : index
    %c0_7 = arith.constant 0 : index
    %8 = vector.load %arg9[%c0_6, %c0_7] : memref<128x128xf32, #tpu.memory_space<vmem>>, vector<128x128xf32>
    tpu.vector_store %arg9[%c0_6, %c0_7], %7 {strides = array<i32>} : memref<128x128xf32, #tpu.memory_space<vmem>>, vector<128x128xf32>,
    %c0_i32_8 = arith.constant 0 : i32
    %9 = arith.cmpi eq, %arg1, %c0_i32_8 : i32
    %10 = arith.extui %9 : i1 to i32
    %c0_i32_9 = arith.constant 0 : i32
    %11 = arith.cmpi ne, %10, %c0_i32_9 : i32
    scf.if %11 {
      %c0_10 = arith.constant 0 : index
      %c0_11 = arith.constant 0 : index
      %12 = vector.load %arg9[%c0_10, %c0_11] : memref<128x128xf32, #tpu.memory_space<vmem>>, vector<128x128xf32>
      %13 = arith.truncf %12 : vector<128x128xf32> to vector<128x128xbf16>
      %c0_12 = arith.constant 0 : index
      %c0_13 = arith.constant 0 : index
      %14 = vector.load %arg5[%c0_12, %c0_13] : memref<128x128xbf16, #tpu.memory_space<vmem>>, vector<128x128xbf16>
      %cst_14 = arith.constant dense<0.000000e+00> : vector<128x128xf32>
      %15 = tpu.matmul %13, %14, %cst_14 {dimension_numbers = #tpu.dot_dimension_numbers<[1], [0], [0], [1], [0, 0, 1, 1], [], []>} : vector<128x128xbf16>, vector<128x128xbf16>, vector<128x128xf32> -> vector<128x128xf32>
      %c0_15 = arith.constant 0 : index
      %c0_16 = arith.constant 0 : index
      %16 = vector.load %arg4[%c0_15, %c0_16] : memref<128x128xbf16, #tpu.memory_space<vmem>>, vector<128x128xbf16>
      %c0_17 = arith.constant 0 : index
      %c0_18 = arith.constant 0 : index
      %17 = vector.load %arg6[%c0_17, %c0_18] : memref<128x128xbf16, #tpu.memory_space<vmem>>, vector<128x128xbf16>
      %cst_19 = arith.constant dense<0.000000e+00> : vector<128x128xf32>
      %18 = tpu.matmul %16, %17, %cst_19 {dimension_numbers = #tpu.dot_dimension_numbers<[1], [0], [0], [1], [0, 0, 1, 1], [], []>} : vector<128x128xbf16>, vector<128x128xbf16>, vector<128x128xf32> -> vector<128x128xf32>
      %19 = arith.addf %15, %18 : vector<128x128xf32>
      %c0_20 = arith.constant 0 : index
      %c0_21 = arith.constant 0 : index
      %20 = vector.load %arg7[%c0_20, %c0_21] : memref<1x128xf32, #tpu.memory_space<vmem>>, vector<1x128xf32>
      %21 = vector.broadcast %20 : vector<1x128xf32> to vector<128x128xf32>
      %22 = arith.addf %19, %21 : vector<128x128xf32>
      %cst_22 = arith.constant 0.000000e+00 : f32
      %23 = vector.broadcast %cst_22 : f32 to vector<128x128xf32>
      %24 = arith.maximumf %22, %23 : vector<128x128xf32>
      %25 = arith.truncf %24 : vector<128x128xf32> to vector<128x128xbf16>
      %c0_23 = arith.constant 0 : index
      %c0_24 = arith.constant 0 : index
      %26 = vector.load %arg8[%c0_23, %c0_24] : memref<128x128xbf16, #tpu.memory_space<vmem>>, vector<128x128xbf16>
      tpu.vector_store %arg8[%c0_23, %c0_24], %25 {strides = array<i32>} : memref<128x128xbf16, #tpu.memory_space<vmem>>, vector<128x128xbf16>,
    } else {
    }
    return
  }
  func.func @transform_0(%arg0: i32, %arg1: i32) -> (i32, i32) {
    %c0_i32 = arith.constant 0 : i32
    return %arg0, %arg1 : i32, i32
  }
  func.func @transform_1(%arg0: i32, %arg1: i32) -> (i32, i32) {
    %c0_i32 = arith.constant 0 : i32
    %c0_i32_0 = arith.constant 0 : i32
    return %arg1, %c0_i32 : i32, i32
  }
  func.func @transform_2(%arg0: i32, %arg1: i32) -> (i32, i32) {
    %c0_i32 = arith.constant 0 : i32
    %c0_i32_0 = arith.constant 0 : i32
    return %arg0, %c0_i32 : i32, i32
  }
  func.func @transform_3(%arg0: i32, %arg1: i32) -> (i32, i32) {
    %c0_i32 = arith.constant 0 : i32
    %c0_i32_0 = arith.constant 0 : i32
    %c0_i32_1 = arith.constant 0 : i32
    return %c0_i32, %c0_i32_0 : i32, i32
  }
  func.func @transform_4(%arg0: i32, %arg1: i32) -> (i32, i32) {
    %c0_i32 = arith.constant 0 : i32
    %c0_i32_0 = arith.constant 0 : i32
    %c0_i32_1 = arith.constant 0 : i32
    return %c0_i32, %c0_i32_0 : i32, i32
  }
  func.func @transform_5(%arg0: i32, %arg1: i32) -> (i32, i32) {
    %c0_i32 = arith.constant 0 : i32
    %c0_i32_0 = arith.constant 0 : i32
    %c0_i32_1 = arith.constant 0 : i32
    return %c0_i32, %c0_i32_0 : i32, i32
  }
  func.func @transform_6(%arg0: i32, %arg1: i32) -> (i32, i32) {
    %c0_i32 = arith.constant 0 : i32
    %c0_i32_0 = arith.constant 0 : i32
    return %arg0, %c0_i32 : i32, i32
  }
}

</mosaic_0001>

<bundles_post_ra>
// kernel: tpu_custom_call.1
= control target key start
LH: loop header
LB: loop body
LE: loop exit
PB: predicated region body
PF: predicated region fallthrough
CT: control target
= control target key end

     0   :  { %11 = vsyncpa [#allocation4], 0  ;;  %s1589_s0 = inlined_call_operand.hbm [shape: bf16[128,128], index: 0, kind: input, shape index: {}]   ;;  %s1590_s1 = inlined_call_operand.hbm [shape: bf16[128,128], index: 1, kind: input, shape index: {}]   ;;  %s1591_s2 = inlined_call_operand.hbm [shape: bf16[128,128], index: 2, kind: input, shape index: {}]   ;;  %s1592_s3 = inlined_call_operand.hbm [shape: bf16[128,128], index: 3, kind: input, shape index: {}]   ;;  %s1593_s4 = inlined_call_operand.hbm [shape: bf16[128,128], index: 4, kind: input, shape index: {}]   ;;  %s1594_s5 = inlined_call_operand.vmem [shape: f32[1,128], index: 5, kind: input, shape index: {}]   ;;  %s1595_s6 = inlined_call_operand.hbm [shape: bf16[128,128], index: 6, kind: output, shape index: {}]  }
   0x1   :  { %12 = vsyncpa [#allocation7], 0 }
   0x2   :  { %13 = vsyncpa [#allocation10], 0 }
   0x3   :  { %14 = vsyncpa [#allocation5], 0  ;;  %s1421_s21 = smov [#allocation6]   ;;  %s1422_s23 = smov [#allocation9]  }
   0x4   :  { %s32_s22 = sshll.u32 %s1421_s21, 4  ;;  %s56_s24 = sshll.u32 %s1422_s23, 4  ;;  %s33_s22 = int_to_ptr.vmem [resolvable:$true] %s32_s22  ;;  %s1464_s24 = int_to_ptr.vmem [resolvable:$true] %s56_s24 }
   0x5   :  { %s1281_s27 = scalar_lea.hbm %s1590_s1, 1024 }
   0x6   :  { %p1282_p0 = scmp.ne.s32.totalorder %s1590_s1, %s1281_s27  ;;  %p1285_p1 = scmp.lt.u32.totalorder %s1281_s27, %s1590_s1 }
   0x8   :  { %p1287_p2 = pnand %p1285_p1, %p1282_p0 }
   0xa   :  { %1290 = shalt.err (!%p1287_p2)
}
   0xb   :  { %s1291_s8 = scalar_lea.vmem %s33_s22, 1024  ;;  %p1296_p4 = scmp.lt.s32.totalorder %s33_s22, %s33_s22 }
   0xc   :  { %p1292_p3 = scmp.ne.s32.totalorder %s33_s22, %s1291_s8  ;;  %p1297_p5 = scmp.lt.s32.totalorder %s1291_s8, %s1291_s8 }
   0xe   :  { %p1298_p6 = por %p1297_p5, %p1296_p4 }
  0x10   :  { %p1299_p7 = pnand %p1298_p6, %p1292_p3 }
  0x12   :  { %1302 = shalt.err (!%p1299_p7)
}
  0x13   :  { %s1423_s9 = smov 64   ;;  %s1424_s10 = smov 4  }
  0x14   :  { %38 = dma.hbm_to_vmem [thread:$0]  %s1590_s1, 1024, %s33_s22, [#allocation7], %s1423_s9, %s1423_s9, %s1424_s10  }
  0x15   :  { %s1303_s15 = scalar_lea.hbm %s1592_s3, 1024 }
  0x16   :  { %p1304_p8 = scmp.ne.s32.totalorder %s1592_s3, %s1303_s15  ;;  %p1307_p9 = scmp.lt.u32.totalorder %s1303_s15, %s1592_s3 }
  0x18   :  { %p1309_p10 = pnand %p1307_p9, %p1304_p8 }
  0x1a   :  { %1312 = shalt.err (!%p1309_p10)
}
  0x1b   :  { %s1313_s20 = scalar_lea.vmem %s1464_s24, 1024  ;;  %p1318_p12 = scmp.lt.s32.totalorder %s1464_s24, %s1464_s24 }
  0x1c   :  { %p1314_p11 = scmp.ne.s32.totalorder %s1464_s24, %s1313_s20  ;;  %p1319_p13 = scmp.lt.s32.totalorder %s1313_s20, %s1313_s20 }
  0x1e   :  { %p1320_p0 = por %p1319_p13, %p1318_p12 }
  0x20   :  { %p1321_p1 = pnand %p1320_p0, %p1314_p11 }
  0x22   :  { %1324 = shalt.err (!%p1321_p1)
}
  0x23   :  { %62 = dma.hbm_to_vmem [thread:$0]  %s1592_s3, 1024, %s1464_s24, [#allocation10], %s1423_s9, %s1423_s9, %s1424_s10  }
  0x24   :  { %s1425_s22 = smov [#allocation3]   ;;  %s1426_s25 = smov [#allocation8]  }
  0x25   :  { %s20_s23 = sshll.u32 %s1425_s22, 4  ;;  %s44_s26 = sshll.u32 %s1426_s25, 4  ;;  %s21_s23 = int_to_ptr.vmem [resolvable:$true] %s20_s23  ;;  %s1501_s26 = int_to_ptr.vmem [resolvable:$true] %s44_s26 }
  0x26   :  { %s1325_s29 = scalar_lea.hbm %s1589_s0, 1024 }
  0x27   :  { %p1326_p2 = scmp.ne.s32.totalorder %s1589_s0, %s1325_s29  ;;  %p1329_p3 = scmp.lt.u32.totalorder %s1325_s29, %s1589_s0 }
  0x29   :  { %p1331_p4 = pnand %p1329_p3, %p1326_p2 }
  0x2b   :  { %1334 = shalt.err (!%p1331_p4)
}
  0x2c   :  { %s1335_s3 = scalar_lea.vmem %s21_s23, 1024  ;;  %p1340_p6 = scmp.lt.s32.totalorder %s21_s23, %s21_s23 }
  0x2d   :  { %p1336_p5 = scmp.ne.s32.totalorder %s21_s23, %s1335_s3  ;;  %p1341_p7 = scmp.lt.s32.totalorder %s1335_s3, %s1335_s3 }
  0x2f   :  { %p1342_p8 = por %p1341_p7, %p1340_p6 }
  0x31   :  { %p1343_p9 = pnand %p1342_p8, %p1336_p5 }
  0x33   :  { %1346 = shalt.err (!%p1343_p9)
}
  0x34   :  { %26 = dma.hbm_to_vmem [thread:$0]  %s1589_s0, 1024, %s21_s23, [#allocation4], %s1423_s9, %s1423_s9, %s1424_s10  }
  0x35   :  { %s1347_s15 = scalar_lea.hbm %s1591_s2, 1024 }
  0x36   :  { %p1348_p10 = scmp.ne.s32.totalorder %s1591_s2, %s1347_s15  ;;  %p1351_p11 = scmp.lt.u32.totalorder %s1347_s15, %s1591_s2 }
  0x38   :  { %p1353_p12 = pnand %p1351_p11, %p1348_p10 }
  0x3a   :  { %1356 = shalt.err (!%p1353_p12)
}
  0x3b   :  { %s1357_s20 = scalar_lea.vmem %s1501_s26, 1024  ;;  %p1362_p0 = scmp.lt.s32.totalorder %s1501_s26, %s1501_s26 }
  0x3c   :  { %p1358_p13 = scmp.ne.s32.totalorder %s1501_s26, %s1357_s20  ;;  %p1363_p1 = scmp.lt.s32.totalorder %s1357_s20, %s1357_s20 }
  0x3e   :  { %p1364_p2 = por %p1363_p1, %p1362_p0 }
  0x40   :  { %p1365_p3 = pnand %p1364_p2, %p1358_p13 }
  0x42   :  { %1368 = shalt.err (!%p1365_p3)
}
  0x43   :  { %50 = dma.hbm_to_vmem [thread:$0]  %s1591_s2, 1024, %s1501_s26, [#allocation7], %s1423_s9, %s1423_s9, %s1424_s10  }
  0x44   :  { %s1427_s21 = smov [#allocation11]   ;;  %s1369_s27 = scalar_lea.hbm %s1593_s4, 1024 }
  0x45   :  { %s68_s22 = sshll.u32 %s1427_s21, 4  ;;  %p1370_p4 = scmp.ne.s32.totalorder %s1593_s4, %s1369_s27  ;;  %s69_s22 = int_to_ptr.vmem [resolvable:$true] %s68_s22 }
  0x46   :  { %p1373_p5 = scmp.lt.u32.totalorder %s1369_s27, %s1593_s4 }
  0x48   :  { %p1375_p6 = pnand %p1373_p5, %p1370_p4 }
  0x4a   :  { %1378 = shalt.err (!%p1375_p6)
}
  0x4b   :  { %s1379_s8 = scalar_lea.vmem %s69_s22, 1024  ;;  %p1384_p8 = scmp.lt.s32.totalorder %s69_s22, %s69_s22 }
  0x4c   :  { %p1380_p7 = scmp.ne.s32.totalorder %s69_s22, %s1379_s8  ;;  %p1385_p9 = scmp.lt.s32.totalorder %s1379_s8, %s1379_s8 }
  0x4e   :  { %p1386_p10 = por %p1385_p9, %p1384_p8 }
  0x50   :  { %p1387_p11 = pnand %p1386_p10, %p1380_p7 }
  0x52   :  { %1390 = shalt.err (!%p1387_p11)
}
  0x53   :  { %74 = dma.hbm_to_vmem [thread:$0]  %s1593_s4, 1024, %s69_s22, [#allocation10], %s1423_s9, %s1423_s9, %s1424_s10  }
  0x54   :  { %1413 = dma.done.wait [#allocation4], 1024  }
  0x55   :  { %1414 = vsyncadd [#allocation4], 4294966272 }
  0x56   :  { %1415 = dma.done.wait [#allocation7], 2048  }
  0x57   :  { %1416 = vsyncadd [#allocation7], 4294965248 }
  0x58   :  { %1417 = dma.done.wait [#allocation10], 2048  }
  0x59   :  { %1418 = vsyncadd [#allocation10], 4294965248  ;;  %v1241_v0 = vld [vmem:[#allocation6] sm:$0xff]   ;;  %v1242_v1 = vld [vmem:[#allocation6 + $0x8] sm:$0xff]  }
  0x5a   :  { %1105 = vmatprep.subr.bf16.mxu0 %v1241_v0  ;;  %v1243_v2 = vld [vmem:[#allocation6 + $0x10] sm:$0xff]   ;;  %v1244_v3 = vld [vmem:[#allocation6 + $0x18] sm:$0xff]   ;;  %v1249_v4 = vld [vmem:[#allocation3] sm:$0xff]  }
  0x5b   :  { %1106 = vmatpush3.bf16.msra.mxu0 %v1241_v0  ;;  %1121 = vmatprep.mubr.bf16.mxu0 %v1249_v4  ;;  %v1245_v5 = vld [vmem:[#allocation6 + $0x20] sm:$0xff]   ;;  %v1246_v6 = vld [vmem:[#allocation6 + $0x28] sm:$0xff]   ;;  %v1247_v9 = vld [vmem:[#allocation6 + $0x30] sm:$0xff]  }
  0x5c   :  { %1107 = vmatprep.subr.bf16.mxu0 %v1242_v1  ;;  %v1257_v7 = vld [vmem:[#allocation11] sm:$0xff]   ;;  %v1258_v8 = vld [vmem:[#allocation11 + $0x8] sm:$0xff]   ;;  %v1259_v10 = vld [vmem:[#allocation11 + $0x10] sm:$0xff]  }
  0x5d   :  { %1137 = vmatprep.subr.bf16.mxu1 %v1257_v7  ;;  %v1248_v11 = vld [vmem:[#allocation6 + $0x38] sm:$0xff]   ;;  %v1261_v13 = vld [vmem:[#allocation11 + $0x20] sm:$0xff]   ;;  %v1250_v16 = vld [vmem:[#allocation3 + $0x8] sm:$0xff]  }
  0x5e   :  { %1138 = vmatpush3.bf16.msra.mxu1 %v1257_v7  ;;  %v1260_v12 = vld [vmem:[#allocation11 + $0x18] sm:$0xff]   ;;  %v1268_v14 = vld [vmem:[#allocation8] sm:$0xff]   ;;  %v1251_v17 = vld [vmem:[#allocation3 + $0x10] sm:$0xff]  }
  0x5f   :  { %1108 = vmatpush3.bf16.msra.mxu0 %v1242_v1  ;;  %1139 = vmatprep.subr.bf16.mxu1 %v1258_v8  ;;  %v1262_v15 = vld [vmem:[#allocation9] sm:$0xff]   ;;  %v1263_v18 = vld [vmem:[#allocation11 + $0x28] sm:$0xff]   ;;  %v1265_v20 = vld [vmem:[#allocation11 + $0x30] sm:$0xff]  }
  0x60   :  { %1109 = vmatprep.subr.bf16.mxu0 %v1243_v2  ;;  %1153 = vmatprep.mubr.bf16.mxu1 %v1268_v14  ;;  %v1264_v19 = vld [vmem:[#allocation9 + $0x8] sm:$0xff]   ;;  %v1266_v21 = vld [vmem:[#allocation9 + $0x10] sm:$0xff]   ;;  %v1252_v22 = vld [vmem:[#allocation3 + $0x18] sm:$0xff]  }
  0x61   :  { %v1253_v23 = vld [vmem:[#allocation3 + $0x20] sm:$0xff]   ;;  %v1267_v24 = vld [vmem:[#allocation11 + $0x38] sm:$0xff]   ;;  %v1254_v27 = vld [vmem:[#allocation3 + $0x28] sm:$0xff]  }
  0x62   :  { %1140 = vmatpush3.bf16.msra.mxu1 %v1258_v8  ;;  %v1269_v25 = vld [vmem:[#allocation9 + $0x18] sm:$0xff]   ;;  %v1271_v26 = vld [vmem:[#allocation9 + $0x20] sm:$0xff]   ;;  %v1270_v28 = vld [vmem:[#allocation8 + $0x8] sm:$0xff]  }
  0x63   :  { %1110 = vmatpush3.bf16.msra.mxu0 %v1243_v2  ;;  %1141 = vmatprep.subr.bf16.mxu1 %v1259_v10  ;;  %v1255_v29 = vld [vmem:[#allocation3 + $0x30] sm:$0xff]   ;;  %v1273_v31 = vld [vmem:[#allocation9 + $0x28] sm:$0xff]   ;;  %v1256_v33 = vld [vmem:[#allocation3 + $0x38] sm:$0xff]  }
  0x64   :  { %1111 = vmatprep.subr.bf16.mxu0 %v1244_v3  ;;  %v1272_v30 = vld [vmem:[#allocation8 + $0x10] sm:$0xff]   ;;  %v1274_v34 = vld [vmem:[#allocation8 + $0x18] sm:$0xff]   ;;  %v1277_v36 = vld [vmem:[#allocation8 + $0x20] sm:$0xff]  }
  0x65   :  { %v1275_v32 = vld [vmem:[#allocation9 + $0x30] sm:$0xff]   ;;  %v1276_v35 = vld [vmem:[#allocation9 + $0x38] sm:$0xff]   ;;  %v1278_v37 = vld [vmem:[#allocation8 + $0x28] sm:$0xff]  }
  0x66   :  { %1142 = vmatpush3.bf16.msra.mxu1 %v1259_v10  ;;  %v1279_v38 = vld [vmem:[#allocation8 + $0x30] sm:$0xff]   ;;  %v1280_v39 = vld [vmem:[#allocation8 + $0x38] sm:$0xff]  }
  0x67   :  { %1112 = vmatpush3.bf16.msra.mxu0 %v1244_v3  ;;  %1143 = vmatprep.subr.bf16.mxu1 %v1260_v12 }
  0x68   :  { %1113 = vmatprep.subr.bf16.mxu0 %v1245_v5 }
  0x6a   :  { %1144 = vmatpush3.bf16.msra.mxu1 %v1260_v12 }
  0x6b   :  { %1114 = vmatpush3.bf16.msra.mxu0 %v1245_v5  ;;  %1145 = vmatprep.subr.bf16.mxu1 %v1261_v13 }
  0x6c   :  { %1115 = vmatprep.subr.bf16.mxu0 %v1246_v6 }
  0x6e   :  { %1146 = vmatpush3.bf16.msra.mxu1 %v1261_v13 }
  0x6f   :  { %1116 = vmatpush3.bf16.msra.mxu0 %v1246_v6  ;;  %1147 = vmatprep.subr.bf16.mxu1 %v1263_v18 }
  0x70   :  { %1117 = vmatprep.subr.bf16.mxu0 %v1247_v9 }
  0x72   :  { %1148 = vmatpush3.bf16.msra.mxu1 %v1263_v18 }
  0x73   :  { %1118 = vmatpush3.bf16.msra.mxu0 %v1247_v9  ;;  %1149 = vmatprep.subr.bf16.mxu1 %v1265_v20  ;;  %v1556_v9 = vld [vmem:[%s1594_s5] ss:$0 sm:$0xff]  ;;  %s1428_s5 = smov [#allocation12]  }
  0x74   :  { %1119 = vmatprep.subr.bf16.mxu0 %v1248_v11  ;;  %s923_s3 = sshll.u32 %s1428_s5, 4  ;;  %s924_s3 = int_to_ptr.vmem [resolvable:$true] %s923_s3 }
  0x75   :  { %s1391_s24 = scalar_lea.vmem %s924_s3, 1024  ;;  %p1396_p13 = scmp.lt.s32.totalorder %s924_s3, %s924_s3 }
  0x76   :  { %1150 = vmatpush3.bf16.msra.mxu1 %v1265_v20  ;;  %p1392_p12 = scmp.ne.s32.totalorder %s924_s3, %s1391_s24  ;;  %p1397_p0 = scmp.lt.s32.totalorder %s1391_s24, %s1391_s24 }
  0x77   :  { %1120 = vmatpush3.bf16.msra.mxu0 %v1248_v11  ;;  %1151 = vmatprep.subr.bf16.mxu1 %v1267_v24 }
  0x78   :  { %1169 = vmatprep.subr.bf16.mxu0 %v1262_v15  ;;  %p1398_p1 = por %p1397_p0, %p1396_p13 }
  0x7a   :  { %1122 = vmatmul.mubr.bf16.vlgmr.msra.gmra.mrb[0].mxu0 %v1250_v16  ;;  %1152 = vmatpush3.bf16.msra.mxu1 %v1267_v24  ;;  %p1399_p2 = pnand %p1398_p1, %p1392_p12 }
  0x7b   :  { %1125 = vmatprep.mubr.bf16.mxu0 %v1251_v17  ;;  %1170 = vmatpush3.bf16.msra.mxu0 %v1262_v15 }
  0x7c   :  { %1171 = vmatprep.subr.bf16.mxu0 %v1264_v19  ;;  %1201 = vmatprep.subr.bf16.mxu1 %v1262_v15 }
  0x7d   :  { %1154 = vmatmul.mubr.bf16.vlgmr.msra.gmra.mrb[0].mxu1 %v1270_v28 }
  0x7e   :  { %1209 = vmatpush3.bf16.msra.mxu1 %v1262_v15  ;;  %1157 = vmatprep.mubr.bf16.mxu1 %v1272_v30 }
  0x7f   :  { %1172 = vmatpush3.bf16.msra.mxu0 %v1264_v19  ;;  %1202 = vmatprep.subr.bf16.mxu1 %v1264_v19 }
  0x80   :  { %1173 = vmatprep.subr.bf16.mxu0 %v1266_v21 }
  0x82   :  { %1126 = vmatmul.mubr.bf16.gmra.mrb[4].mxu0 %v1252_v22  ;;  %1210 = vmatpush3.bf16.msra.mxu1 %v1264_v19 }
  0x83   :  { %1129 = vmatprep.mubr.bf16.mxu0 %v1253_v23  ;;  %1174 = vmatpush3.bf16.msra.mxu0 %v1266_v21 }
  0x84   :  { %1175 = vmatprep.subr.bf16.mxu0 %v1269_v25  ;;  %1203 = vmatprep.subr.bf16.mxu1 %v1266_v21 }
  0x85   :  { %1158 = vmatmul.mubr.bf16.gmra.mrb[4].mxu1 %v1274_v34 }
  0x86   :  { %1211 = vmatpush3.bf16.msra.mxu1 %v1266_v21  ;;  %1161 = vmatprep.mubr.bf16.mxu1 %v1277_v36 }
  0x87   :  { %1176 = vmatpush3.bf16.msra.mxu0 %v1269_v25  ;;  %1204 = vmatprep.subr.bf16.mxu1 %v1269_v25 }
  0x88   :  { %1177 = vmatprep.subr.bf16.mxu0 %v1271_v26 }
  0x8a   :  { %1130 = vmatmul.mubr.bf16.gmra.mrb[8].mxu0 %v1254_v27  ;;  %1212 = vmatpush3.bf16.msra.mxu1 %v1269_v25 }
  0x8b   :  { %1133 = vmatprep.mubr.bf16.mxu0 %v1255_v29  ;;  %1178 = vmatpush3.bf16.msra.mxu0 %v1271_v26 }
  0x8c   :  { %1179 = vmatprep.subr.bf16.mxu0 %v1273_v31  ;;  %1205 = vmatprep.subr.bf16.mxu1 %v1271_v26 }
  0x8d   :  { %1162 = vmatmul.mubr.bf16.gmra.mrb[8].mxu1 %v1278_v37 }
  0x8e   :  { %1213 = vmatpush3.bf16.msra.mxu1 %v1271_v26  ;;  %1165 = vmatprep.mubr.bf16.mxu1 %v1279_v38 }
  0x8f   :  { %1180 = vmatpush3.bf16.msra.mxu0 %v1273_v31  ;;  %1206 = vmatprep.subr.bf16.mxu1 %v1273_v31 }
  0x90   :  { %1181 = vmatprep.subr.bf16.mxu0 %v1275_v32 }
  0x92   :  { %1134 = vmatmul.mubr.bf16.gmra.mrb[12].mxu0 %v1256_v33  ;;  %1214 = vmatpush3.bf16.msra.mxu1 %v1273_v31 }
  0x93   :  { %1182 = vmatpush3.bf16.msra.mxu0 %v1275_v32  ;;  %1207 = vmatprep.subr.bf16.mxu1 %v1275_v32 }
  0x94   :  { %1183 = vmatprep.subr.bf16.mxu0 %v1276_v35 }
  0x95   :  { %1166 = vmatmul.mubr.bf16.gmra.mrb[12].mxu1 %v1280_v39 }
  0x96   :  { %1215 = vmatpush3.bf16.msra.mxu1 %v1275_v32 }
  0x97   :  { %1208 = vmatprep.subr.bf16.mxu1 %v1276_v35  ;;  %1184 = vmatpush3.bf16.msra.mxu0 %v1276_v35 }
  0x9a   :  { %1216 = vmatpush3.bf16.msra.mxu1 %v1276_v35 }
 0x14d   :  { %v1123_v40 = vpop.f32.mrb[0].mxu0 }
 0x14e   :  { %v291_v41 = vpop.f32.mrb[1].mxu0 }
 0x14f   :  { %v1124_v42 = vpop.f32.mrb[2].mxu0 }
 0x150   :  { %v406_v43 = vpack.c.bf16 %v1124_v42, %v1123_v40  ;;  %v294_v44 = vpop.f32.mrb[3].mxu0  ;;  %v1155_v53 = vpop.f32.mrb[0].mxu1 }
 0x151   :  { %v405_v45 = vpack.c.bf16 %v294_v44, %v291_v41  ;;  %v591_v55 = vpop.f32.mrb[1].mxu1 }
 0x152   :  { %v1156_v57 = vpop.f32.mrb[2].mxu1 }
 0x153   :  { %1185 = vmatprep.mubr.bf16.mxu0 %v405_v45  ;;  %v594_v60 = vpop.f32.mrb[3].mxu1 }
 0x154   :  { %1186 = vmatmul.mubr.bf16.vlgmr.msra.gmra.mrb[16].mxu0 %v406_v43 }
 0x155   :  { %v1127_v46 = vpop.f32.mrb[4].mxu0 }
 0x156   :  { %v307_v47 = vpop.f32.mrb[5].mxu0 }
 0x157   :  { %v1128_v48 = vpop.f32.mrb[6].mxu0 }
 0x158   :  { %v408_v49 = vpack.c.bf16 %v1128_v48, %v1127_v46  ;;  %v310_v50 = vpop.f32.mrb[7].mxu0  ;;  %v1159_v63 = vpop.f32.mrb[4].mxu1 }
 0x159   :  { %v407_v51 = vpack.c.bf16 %v310_v50, %v307_v47  ;;  %v607_v1 = vpop.f32.mrb[5].mxu1 }
 0x15a   :  { %v1160_v3 = vpop.f32.mrb[6].mxu1 }
 0x15b   :  { %1189 = vmatprep.mubr.bf16.mxu0 %v407_v51  ;;  %v610_v6 = vpop.f32.mrb[7].mxu1 }
 0x15c   :  { %1190 = vmatmul.mubr.bf16.gmra.mrb[20].mxu0 %v408_v49 }
 0x15d   :  { %v1131_v52 = vpop.f32.mrb[8].mxu0 }
 0x15e   :  { %v323_v54 = vpop.f32.mrb[9].mxu0 }
 0x15f   :  { %v1132_v56 = vpop.f32.mrb[10].mxu0 }
 0x160   :  { %v410_v58 = vpack.c.bf16 %v1132_v56, %v1131_v52  ;;  %v326_v59 = vpop.f32.mrb[11].mxu0 }
 0x161   :  { %v409_v61 = vpack.c.bf16 %v326_v59, %v323_v54 }
 0x163   :  { %1193 = vmatprep.mubr.bf16.mxu1 %v409_v61 }
 0x164   :  { %1194 = vmatmul.mubr.bf16.vlgmr.msra.gmra.mrb[8].mxu1 %v410_v58 }
 0x165   :  { %v1135_v62 = vpop.f32.mrb[12].mxu0 }
 0x166   :  { %v339_v0 = vpop.f32.mrb[13].mxu0 }
 0x167   :  { %v1136_v2 = vpop.f32.mrb[14].mxu0 }
 0x168   :  { %v412_v4 = vpack.c.bf16 %v1136_v2, %v1135_v62  ;;  %v342_v5 = vpop.f32.mrb[15].mxu0 }
 0x169   :  { %v411_v7 = vpack.c.bf16 %v342_v5, %v339_v0 }
 0x16b   :  { %1197 = vmatprep.mubr.bf16.mxu1 %v411_v7 }
 0x16c   :  { %1198 = vmatmul.mubr.bf16.gmra.mrb[12].mxu1 %v412_v4 }
 0x227   :  { %v1187_v8 = vpop.f32.mrb[16].mxu0 }
 0x228   :  { %v745_v10 = vadd.f32 %v1187_v8, %v1155_v53  ;;  %v736_v11 = vpop.f32.mrb[17].mxu0 }
 0x229   :  { %v737_v12 = vadd.f32 %v736_v11, %v591_v55  ;;  %v1188_v13 = vpop.f32.mrb[18].mxu0 }
 0x22a   :  { %v808_v14 = vadd.f32 %v1556_v9, %v745_v10  ;;  %v748_v15 = vadd.f32 %v1188_v13, %v1156_v57  ;;  %v739_v16 = vpop.f32.mrb[19].mxu0 }
 0x22b   :  { %v806_v17 = vadd.f32 %v1556_v9, %v737_v12  ;;  %v740_v18 = vadd.f32 %v739_v16, %v594_v60 }
 0x22c   :  { %v809_v19 = vadd.f32 %v1556_v9, %v748_v15  ;;  %v824_v21 = vmax.f32 %v808_v14, 0.0 }
 0x22d   :  { %v807_v20 = vadd.f32 %v1556_v9, %v740_v18  ;;  %v822_v23 = vmax.f32 %v806_v17, 0.0 }
 0x22e   :  { %v825_v22 = vmax.f32 %v809_v19, 0.0 }
 0x22f   :  { %v823_v24 = vmax.f32 %v807_v20, 0.0  ;;  %v1191_v25 = vpop.f32.mrb[20].mxu0 }
 0x230   :  { %v1018_v26 = vpack.c.bf16 %v825_v22, %v824_v21  ;;  %v761_v27 = vadd.f32 %v1191_v25, %v1159_v63  ;;  %v752_v28 = vpop.f32.mrb[21].mxu0 }
 0x231   :  { %v1013_v29 = vpack.c.bf16 %v823_v24, %v822_v23  ;;  %v753_v30 = vadd.f32 %v752_v28, %v607_v1  ;;  %v1192_v31 = vpop.f32.mrb[22].mxu0 }
 0x232   :  { %1050 = vst [vmem:[#allocation12 + $0x8] sm:$0xff] %v1018_v26   ;;  %v812_v32 = vadd.f32 %v1556_v9, %v761_v27  ;;  %v764_v33 = vadd.f32 %v1192_v31, %v1160_v3  ;;  %v755_v34 = vpop.f32.mrb[23].mxu0 }
 0x233   :  { %1014 = vst [vmem:[#allocation12] sm:$0xff] %v1013_v29   ;;  %v810_v35 = vadd.f32 %v1556_v9, %v753_v30  ;;  %v756_v36 = vadd.f32 %v755_v34, %v610_v6 }
 0x234   :  { %v813_v37 = vadd.f32 %v1556_v9, %v764_v33  ;;  %v828_v39 = vmax.f32 %v812_v32, 0.0 }
 0x235   :  { %v811_v38 = vadd.f32 %v1556_v9, %v756_v36  ;;  %v826_v41 = vmax.f32 %v810_v35, 0.0 }
 0x236   :  { %v829_v40 = vmax.f32 %v813_v37, 0.0 }
 0x237   :  { %v827_v42 = vmax.f32 %v811_v38, 0.0  ;;  %v1195_v43 = vpop.f32.mrb[8].mxu1 }
 0x238   :  { %v1028_v44 = vpack.c.bf16 %v829_v40, %v828_v39  ;;  %v816_v45 = vadd.f32 %v1195_v43, %v1556_v9  ;;  %v768_v46 = vpop.f32.mrb[9].mxu1 }
 0x239   :  { %v1023_v47 = vpack.c.bf16 %v827_v42, %v826_v41  ;;  %v814_v48 = vadd.f32 %v1556_v9, %v768_v46  ;;  %v1196_v49 = vpop.f32.mrb[10].mxu1 }
 0x23a   :  { %1052 = vst [vmem:[#allocation12 + $0x18] sm:$0xff] %v1028_v44   ;;  %v817_v50 = vadd.f32 %v1196_v49, %v1556_v9  ;;  %v771_v51 = vpop.f32.mrb[11].mxu1  ;;  %v832_v53 = vmax.f32 %v816_v45, 0.0 }
 0x23b   :  { %1051 = vst [vmem:[#allocation12 + $0x10] sm:$0xff] %v1023_v47   ;;  %v815_v52 = vadd.f32 %v1556_v9, %v771_v51  ;;  %v830_v55 = vmax.f32 %v814_v48, 0.0 }
 0x23c   :  { %v833_v54 = vmax.f32 %v817_v50, 0.0 }
 0x23d   :  { %v831_v56 = vmax.f32 %v815_v52, 0.0 }
 0x23e   :  { %v1038_v57 = vpack.c.bf16 %v833_v54, %v832_v53 }
 0x23f   :  { %v1033_v58 = vpack.c.bf16 %v831_v56, %v830_v55  ;;  %v1199_v59 = vpop.f32.mrb[12].mxu1 }
 0x240   :  { %1054 = vst [vmem:[#allocation12 + $0x28] sm:$0xff] %v1038_v57   ;;  %v820_v60 = vadd.f32 %v1199_v59, %v1556_v9  ;;  %v784_v61 = vpop.f32.mrb[13].mxu1 }
 0x241   :  { %1053 = vst [vmem:[#allocation12 + $0x20] sm:$0xff] %v1033_v58   ;;  %v818_v62 = vadd.f32 %v1556_v9, %v784_v61  ;;  %v1200_v63 = vpop.f32.mrb[14].mxu1 }
 0x242   :  { %v821_v0 = vadd.f32 %v1200_v63, %v1556_v9  ;;  %v787_v1 = vpop.f32.mrb[15].mxu1  ;;  %v836_v3 = vmax.f32 %v820_v60, 0.0 }
 0x243   :  { %v819_v2 = vadd.f32 %v1556_v9, %v787_v1  ;;  %v834_v5 = vmax.f32 %v818_v62, 0.0 }
 0x244   :  { %v837_v4 = vmax.f32 %v821_v0, 0.0 }
 0x245   :  { %v835_v6 = vmax.f32 %v819_v2, 0.0 }
 0x246   :  { %v1048_v7 = vpack.c.bf16 %v837_v4, %v836_v3 }
 0x247   :  { %v1043_v8 = vpack.c.bf16 %v835_v6, %v834_v5 }
 0x248   :  { %1056 = vst [vmem:[#allocation12 + $0x38] sm:$0xff] %v1048_v7  }
 0x249   :  { %1055 = vst [vmem:[#allocation12 + $0x30] sm:$0xff] %v1043_v8  }
 0x24a   :  { %1402 = shalt.err (!%p1399_p2)
}
 0x24b   :  { %s1403_s14 = scalar_lea.hbm %s1595_s6, 1024 }
 0x24c   :  { %p1404_p3 = scmp.ne.s32.totalorder %s1595_s6, %s1403_s14  ;;  %p1407_p4 = scmp.lt.u32.totalorder %s1403_s14, %s1595_s6 }
 0x24e   :  { %p1409_p5 = pnand %p1407_p4, %p1404_p3 }
 0x250   :  { %1412 = shalt.err (!%p1409_p5)
}
 0x251   :  { %929 = dma.vmem_to_hbm [thread:$0]  %s924_s3, 1024, %s1595_s6, [#allocation5], %s1423_s9, %s1423_s9, %s1424_s10  }
 0x252   :  { %1419 = dma.done.wait [#allocation5], 1024  }
 0x253   :  { %1420 = vsyncadd [#allocation5], 4294966272 }
 0x254   :  { %933 = vsyncpa [#allocation4], 1 }
 0x255   :  { %934 = vsyncpa [#allocation7], 1 }
 0x256   :  { %935 = vsyncpa [#allocation10], 1 }
 0x257   :  { %936 = vsyncpa [#allocation5], 1 }

</bundles_post_ra>
